<compile_context>
chip_gen: v6e
topology: v6e:2x2x1
jax: 0.10.0
libtpu: 0.0.40
codegen_flags: <defaults>
</compile_context>

<pallas_src>
import jax
import jax.numpy as jnp
from jax.experimental import pallas as pl
from jax.experimental.pallas import tpu as pltpu


def _snn_seq_kernel(sigma_ref,                   # SMEM scalar-prefetch, shape (1,)
                    u_ref,                       # (B, I)  input at this timestep
                    x0_ref, spk0_ref,            # (B, R)  initial state / initial x-spike
                    w_in_ref, w_rec_ref,         # (I, R) = k*w_in_t, (R, R) = (1-k)*w_t
                    bias_ref,                    # (1, R)
                    xn_ref, vx_ref, spkx_ref,    # (B, R)  per-step outputs
                    x_sc, spk_sc):               # VMEM scratch carried across grid steps
    t = pl.program_id(0)

    # Seed the on-chip recurrent state from the initial-state inputs.
    @pl.when(t == 0)
    def _():
        x_sc[...] = x0_ref[...]
        spk_sc[...] = spk0_ref[...]

    sigma = sigma_ref[0]

    # x_n = prev_x_n @ ((1-k)*w_t) + u_n @ (k*w_in_t) + bias   (k folded into weights)
    xn = (jnp.dot(x_sc[...], w_rec_ref[...], preferred_element_type=jnp.float32)
          + jnp.dot(u_ref[...], w_in_ref[...], preferred_element_type=jnp.float32)
          + bias_ref[...])

    # Reference zeroes prev_spike[:, :I] before the voltage update, so only the
    # reservoir part of the previous spike contributes; the u-part of current_v
    # is just u_n and is handled (lane-aligned) in the wrapper.
    v_x = xn - sigma * spk_sc[...]
    spike_x = jnp.where(v_x > 1.0, 1.0, 0.0)     # heaviside: max(0, sign(v-1))

    xn_ref[...] = xn
    vx_ref[...] = v_x
    spkx_ref[...] = spike_x

    # Carry state to the next timestep (stays in VMEM).
    x_sc[...] = xn
    spk_sc[...] = spike_x


def r_sp_link_snn_forward_seq(u_seq, x_state, params):
    """Run the SNN recurrence over a whole (T, B, I) input sequence in one kernel.

    Returns (spike_seq (T, B, I+R), new_state) where new_state matches the
    module's state dict after the last timestep.
    """
    w_in_t = params["w_in_t"]     # (I, R)
    w_t = params["w_t"]           # (R, R)
    bias = params["bias"]         # (1, R)
    k = params["k"]
    sigma = params["sigma"]

    T, B, I = u_seq.shape
    R = w_t.shape[0]

    # Fold k into the weights once per sequence (no per-step scaling on the VPU).
    w_in_scaled = (k * w_in_t).astype(jnp.float32)          # (I, R)
    w_rec_scaled = ((1.0 - k) * w_t).astype(jnp.float32)    # (R, R)

    x0 = x_state["state"].astype(jnp.float32)               # (B, R)
    spk0_x = x_state["output"][:, I:].astype(jnp.float32)   # (B, R); u-part is zeroed by the ref

    sigma_arr = jnp.asarray(sigma, jnp.float32).reshape(1)

    grid_spec = pltpu.PrefetchScalarGridSpec(
        num_scalar_prefetch=1,
        grid=(T,),
        in_specs=[
            pl.BlockSpec((None, B, I), lambda t, sig: (t, 0, 0)),  # u_seq[t]  (streamed)
            pl.BlockSpec((B, R), lambda t, sig: (0, 0)),           # x0        (resident)
            pl.BlockSpec((B, R), lambda t, sig: (0, 0)),           # spk0_x    (resident)
            pl.BlockSpec((I, R), lambda t, sig: (0, 0)),           # k * w_in_t
            pl.BlockSpec((R, R), lambda t, sig: (0, 0)),           # (1-k) * w_t
            pl.BlockSpec((1, R), lambda t, sig: (0, 0)),           # bias
        ],
        out_specs=[
            pl.BlockSpec((None, B, R), lambda t, sig: (t, 0, 0)),  # x_n[t]
            pl.BlockSpec((None, B, R), lambda t, sig: (t, 0, 0)),  # v_x[t]
            pl.BlockSpec((None, B, R), lambda t, sig: (t, 0, 0)),  # spike_x[t]
        ],
        scratch_shapes=[
            pltpu.VMEM((B, R), jnp.float32),   # recurrent state x_n
            pltpu.VMEM((B, R), jnp.float32),   # previous reservoir spike
        ],
    )

    x_seq, vx_seq, spkx_seq = pl.pallas_call(
        _snn_seq_kernel,
        grid_spec=grid_spec,
        out_shape=(
            jax.ShapeDtypeStruct((T, B, R), jnp.float32),
            jax.ShapeDtypeStruct((T, B, R), jnp.float32),
            jax.ShapeDtypeStruct((T, B, R), jnp.float32),
        ),
        compiler_params=pltpu.CompilerParams(
            dimension_semantics=("arbitrary",),   # time axis is a true recurrence
        ),
    )(sigma_arr, u_seq, x0, spk0_x, w_in_scaled, w_rec_scaled, bias)

    # Trivial, lane-aligned u-part pieces assembled outside the kernel
    # (v_u == u_n; spike_u == heaviside(u_n - 1) since prev_spike[:, :I] is zeroed).
    spike_u_seq = jnp.where(u_seq > 1.0, 1.0, 0.0).astype(jnp.float32)
    spike_seq = jnp.concatenate([spike_u_seq, spkx_seq], axis=-1)   # (T, B, I+R)
    v_seq = jnp.concatenate([u_seq.astype(jnp.float32), vx_seq], axis=-1)

    new_state = {"state": x_seq[-1], "output": spike_seq[-1], "v": v_seq[-1]}
    return spike_seq, new_state


def r_sp_link_snn_forward(u_n, x_state, params):
    """Single-timestep interface matching the torch module (T = 1 fused call)."""
    spike_seq, new_state = r_sp_link_snn_forward_seq(u_n[None], x_state, params)
    return spike_seq[0], new_state


def _reference_step(u_n, x_state, params):
    """Pure-JAX transcription of the PyTorch forward (one timestep)."""
    k = params["k"]
    sigma = params["sigma"]
    x_n = ((1.0 - k) * x_state["state"] @ params["w_t"]
           + k * u_n @ params["w_in_t"]
           + params["bias"])
    input_size = u_n.shape[-1]
    prev_spike = x_state["output"].at[:, :input_size].set(0.0)
    z_n = jnp.concatenate([u_n, x_n], axis=1)
    current_v = z_n - sigma * prev_spike
    spike = jnp.maximum(0.0, jnp.sign(current_v - 1.0))
    return spike, {"state": x_n, "output": spike, "v": current_v}


if __name__ == "__main__":
    T, B, I, R = 8, 4, 16, 32   # seq len, batch, input_size, r_states

    key = jax.random.PRNGKey(0)
    k0, k1, k2, k3, k4, k5 = jax.random.split(key, 6)

    # Deterministic synthetic parameters (xavier-uniform-style bounds).
    a_in = (6.0 / (I + R)) ** 0.5
    a_w = (6.0 / (R + R)) ** 0.5
    params = {
        "w_in_t": jax.random.uniform(k0, (I, R), jnp.float32, -a_in, a_in),
        "w_t":    jax.random.uniform(k1, (R, R), jnp.float32, -a_w, a_w),
        "bias":   jax.random.uniform(k2, (1, R), jnp.float32, 0.0, 1.0),
        "k":      jnp.float32(0.9),
        "sigma":  jnp.float32(0.9),
    }

    u_seq = jax.random.uniform(k3, (T, B, I), jnp.float32, 0.0, 2.0)
    x_state0 = {
        "state":  jax.random.uniform(k4, (B, R), jnp.float32, 0.0, 1.0),
        "output": (jax.random.uniform(k5, (B, I + R)) > 0.5).astype(jnp.float32),
        "v":      jnp.zeros((B, I + R), jnp.float32),
    }

    # Fused Pallas run over the whole sequence (single pallas_call).
    spike_seq, new_state = r_sp_link_snn_forward_seq(u_seq, x_state0, params)
    jax.block_until_ready(spike_seq)

    # Pure-JAX reference: step-by-step recurrence.
    ref_state = x_state0
    ref_spikes = []
    for t in range(T):
        spk, ref_state = _reference_step(u_seq[t], ref_state, params)
        ref_spikes.append(spk)
    ref_spike_seq = jnp.stack(ref_spikes, axis=0)

    assert jnp.allclose(spike_seq, ref_spike_seq, atol=1e-5), "spike sequence mismatch"
    assert jnp.allclose(new_state["state"], ref_state["state"], atol=1e-5), "x_n mismatch"
    assert jnp.allclose(new_state["output"], ref_state["output"], atol=1e-5), "output mismatch"
    assert jnp.allclose(new_state["v"], ref_state["v"], atol=1e-5), "current_v mismatch"

    # TODO(synk): for v7x, independent sequences could be sharded across the 2
    # TensorCores with an extra "parallel" grid axis; with B=4 it is moot here.
    print("KERNEL_OK")
</pallas_src>

<mosaic_0001>
module attributes {stable_mosaic.version = 11 : i64} {
  func.func @_snn_seq_kernel(%arg0: i32, %arg1: memref<1xf32, #tpu.memory_space<smem>>, %arg2: memref<1x4x16xf32, #tpu.memory_space<vmem>>, %arg3: memref<4x32xf32, #tpu.memory_space<vmem>>, %arg4: memref<4x32xf32, #tpu.memory_space<vmem>>, %arg5: memref<16x32xf32, #tpu.memory_space<vmem>>, %arg6: memref<32x32xf32, #tpu.memory_space<vmem>>, %arg7: memref<1x32xf32, #tpu.memory_space<vmem>>, %arg8: memref<1x4x32xf32, #tpu.memory_space<vmem>>, %arg9: memref<1x4x32xf32, #tpu.memory_space<vmem>>, %arg10: memref<1x4x32xf32, #tpu.memory_space<vmem>>, %arg11: memref<4x32xf32, #tpu.memory_space<vmem>>, %arg12: memref<4x32xf32, #tpu.memory_space<vmem>>) attributes {dimension_semantics = [#tpu.dimension_semantics<arbitrary>], iteration_bounds = array<i64: 8>, scalar_prefetch = 1 : i64, scratch_operands = 2 : i64, tpu.core_type = #tpu.core_type<tc>, window_params = [{transform_indices = @transform_0, window_bounds = array<i64: 1, 4, 16>}, {pipeline_mode = #tpu.pipeline_mode<synchronous>, transform_indices = @transform_1, window_bounds = array<i64: 4, 32>}, {pipeline_mode = #tpu.pipeline_mode<synchronous>, transform_indices = @transform_2, window_bounds = array<i64: 4, 32>}, {pipeline_mode = #tpu.pipeline_mode<synchronous>, transform_indices = @transform_3, window_bounds = array<i64: 16, 32>}, {pipeline_mode = #tpu.pipeline_mode<synchronous>, transform_indices = @transform_4, window_bounds = array<i64: 32, 32>}, {pipeline_mode = #tpu.pipeline_mode<synchronous>, transform_indices = @transform_5, window_bounds = array<i64: 1, 32>}, {transform_indices = @transform_6, window_bounds = array<i64: 1, 4, 32>}, {transform_indices = @transform_7, window_bounds = array<i64: 1, 4, 32>}, {transform_indices = @transform_8, window_bounds = array<i64: 1, 4, 32>}]} {
    %c0_i32 = arith.constant 0 : i32
    %0 = arith.cmpi eq, %arg0, %c0_i32 : i32
    %1 = arith.extui %0 : i1 to i32
    %c0_i32_0 = arith.constant 0 : i32
    %2 = arith.cmpi ne, %1, %c0_i32_0 : i32
    scf.if %2 {
      %c0_31 = arith.constant 0 : index
      %c0_32 = arith.constant 0 : index
      %35 = vector.load %arg3[%c0_31, %c0_32] : memref<4x32xf32, #tpu.memory_space<vmem>>, vector<4x32xf32>
      %c0_33 = arith.constant 0 : index
      %c0_34 = arith.constant 0 : index
      %36 = vector.load %arg11[%c0_33, %c0_34] : memref<4x32xf32, #tpu.memory_space<vmem>>, vector<4x32xf32>
      tpu.vector_store %arg11[%c0_33, %c0_34], %35 {strides = array<i32>} : memref<4x32xf32, #tpu.memory_space<vmem>>, vector<4x32xf32>,
      %c0_35 = arith.constant 0 : index
      %c0_36 = arith.constant 0 : index
      %37 = vector.load %arg4[%c0_35, %c0_36] : memref<4x32xf32, #tpu.memory_space<vmem>>, vector<4x32xf32>
      %c0_37 = arith.constant 0 : index
      %c0_38 = arith.constant 0 : index
      %38 = vector.load %arg12[%c0_37, %c0_38] : memref<4x32xf32, #tpu.memory_space<vmem>>, vector<4x32xf32>
      tpu.vector_store %arg12[%c0_37, %c0_38], %37 {strides = array<i32>} : memref<4x32xf32, #tpu.memory_space<vmem>>, vector<4x32xf32>,
    } else {
    }
    %c0 = arith.constant 0 : index
    %3 = memref.load %arg1[%c0] : memref<1xf32, #tpu.memory_space<smem>>
    %c0_1 = arith.constant 0 : index
    %c0_2 = arith.constant 0 : index
    %4 = vector.load %arg11[%c0_1, %c0_2] : memref<4x32xf32, #tpu.memory_space<vmem>>, vector<4x32xf32>
    %c0_3 = arith.constant 0 : index
    %c0_4 = arith.constant 0 : index
    %5 = vector.load %arg6[%c0_3, %c0_4] : memref<32x32xf32, #tpu.memory_space<vmem>>, vector<32x32xf32>
    %cst = arith.constant dense<0.000000e+00> : vector<4x32xf32>
    %6 = tpu.matmul %4, %5, %cst {dimension_numbers = #tpu.dot_dimension_numbers<[1], [0], [0], [1], [0, 0, 1, 1], [], []>} : vector<4x32xf32>, vector<32x32xf32>, vector<4x32xf32> -> vector<4x32xf32>
    %c0_5 = arith.constant 0 : index
    %c0_6 = arith.constant 0 : index
    %c0_7 = arith.constant 0 : index
    %7 = vector.load %arg2[%c0_5, %c0_6, %c0_7] : memref<1x4x16xf32, #tpu.memory_space<vmem>>, vector<1x4x16xf32>
    %8 = vector.shape_cast %7 : vector<1x4x16xf32> to vector<4x16xf32>
    %c0_8 = arith.constant 0 : index
    %c0_9 = arith.constant 0 : index
    %9 = vector.load %arg5[%c0_8, %c0_9] : memref<16x32xf32, #tpu.memory_space<vmem>>, vector<16x32xf32>
    %cst_10 = arith.constant dense<0.000000e+00> : vector<4x32xf32>
    %10 = tpu.matmul %8, %9, %cst_10 {dimension_numbers = #tpu.dot_dimension_numbers<[1], [0], [0], [1], [0, 0, 1, 1], [], []>} : vector<4x16xf32>, vector<16x32xf32>, vector<4x32xf32> -> vector<4x32xf32>
    %11 = arith.addf %6, %10 : vector<4x32xf32>
    %c0_11 = arith.constant 0 : index
    %c0_12 = arith.constant 0 : index
    %12 = vector.load %arg7[%c0_11, %c0_12] : memref<1x32xf32, #tpu.memory_space<vmem>>, vector<1x32xf32>
    %13 = vector.broadcast %12 : vector<1x32xf32> to vector<4x32xf32>
    %14 = arith.addf %11, %13 : vector<4x32xf32>
    %c0_13 = arith.constant 0 : index
    %c0_14 = arith.constant 0 : index
    %15 = vector.load %arg12[%c0_13, %c0_14] : memref<4x32xf32, #tpu.memory_space<vmem>>, vector<4x32xf32>
    %16 = vector.broadcast %3 : f32 to vector<4x32xf32>
    %17 = arith.mulf %16, %15 : vector<4x32xf32>
    %18 = arith.subf %14, %17 : vector<4x32xf32>
    %cst_15 = arith.constant 1.000000e+00 : f32
    %19 = vector.broadcast %cst_15 : f32 to vector<4x32xf32>
    %20 = arith.cmpf ogt, %18, %19 : vector<4x32xf32>
    %cst_16 = arith.constant 1.000000e+00 : f32
    %cst_17 = arith.constant 0.000000e+00 : f32
    %21 = vector.broadcast %cst_16 : f32 to vector<4x32xf32>
    %22 = vector.broadcast %cst_17 : f32 to vector<4x32xf32>
    %23 = arith.select %20, %21, %22 : vector<4x32xi1>, vector<4x32xf32>
    %c0_18 = arith.constant 0 : index
    %c0_19 = arith.constant 0 : index
    %c0_20 = arith.constant 0 : index
    %24 = vector.load %arg8[%c0_18, %c0_19, %c0_20] : memref<1x4x32xf32, #tpu.memory_space<vmem>>, vector<1x4x32xf32>
    %25 = vector.shape_cast %24 : vector<1x4x32xf32> to vector<4x32xf32>
    %26 = vector.shape_cast %14 : vector<4x32xf32> to vector<1x4x32xf32>
    tpu.vector_store %arg8[%c0_18, %c0_19, %c0_20], %26 {strides = array<i32>} : memref<1x4x32xf32, #tpu.memory_space<vmem>>, vector<1x4x32xf32>,
    %c0_21 = arith.constant 0 : index
    %c0_22 = arith.constant 0 : index
    %c0_23 = arith.constant 0 : index
    %27 = vector.load %arg9[%c0_21, %c0_22, %c0_23] : memref<1x4x32xf32, #tpu.memory_space<vmem>>, vector<1x4x32xf32>
    %28 = vector.shape_cast %27 : vector<1x4x32xf32> to vector<4x32xf32>
    %29 = vector.shape_cast %18 : vector<4x32xf32> to vector<1x4x32xf32>
    tpu.vector_store %arg9[%c0_21, %c0_22, %c0_23], %29 {strides = array<i32>} : memref<1x4x32xf32, #tpu.memory_space<vmem>>, vector<1x4x32xf32>,
    %c0_24 = arith.constant 0 : index
    %c0_25 = arith.constant 0 : index
    %c0_26 = arith.constant 0 : index
    %30 = vector.load %arg10[%c0_24, %c0_25, %c0_26] : memref<1x4x32xf32, #tpu.memory_space<vmem>>, vector<1x4x32xf32>
    %31 = vector.shape_cast %30 : vector<1x4x32xf32> to vector<4x32xf32>
    %32 = vector.shape_cast %23 : vector<4x32xf32> to vector<1x4x32xf32>
    tpu.vector_store %arg10[%c0_24, %c0_25, %c0_26], %32 {strides = array<i32>} : memref<1x4x32xf32, #tpu.memory_space<vmem>>, vector<1x4x32xf32>,
    %c0_27 = arith.constant 0 : index
    %c0_28 = arith.constant 0 : index
    %33 = vector.load %arg11[%c0_27, %c0_28] : memref<4x32xf32, #tpu.memory_space<vmem>>, vector<4x32xf32>
    tpu.vector_store %arg11[%c0_27, %c0_28], %14 {strides = array<i32>} : memref<4x32xf32, #tpu.memory_space<vmem>>, vector<4x32xf32>,
    %c0_29 = arith.constant 0 : index
    %c0_30 = arith.constant 0 : index
    %34 = vector.load %arg12[%c0_29, %c0_30] : memref<4x32xf32, #tpu.memory_space<vmem>>, vector<4x32xf32>
    tpu.vector_store %arg12[%c0_29, %c0_30], %23 {strides = array<i32>} : memref<4x32xf32, #tpu.memory_space<vmem>>, vector<4x32xf32>,
    return
  }
  func.func @transform_0(%arg0: i32, %arg1: memref<1xf32, #tpu.memory_space<smem>>) -> (i32, i32, i32) {
    %c0_i32 = arith.constant 0 : i32
    %c0_i32_0 = arith.constant 0 : i32
    %c0_i32_1 = arith.constant 0 : i32
    return %arg0, %c0_i32, %c0_i32_0 : i32, i32, i32
  }
  func.func @transform_1(%arg0: i32, %arg1: memref<1xf32, #tpu.memory_space<smem>>) -> (i32, i32) {
    %c0_i32 = arith.constant 0 : i32
    %c0_i32_0 = arith.constant 0 : i32
    %c0_i32_1 = arith.constant 0 : i32
    return %c0_i32, %c0_i32_0 : i32, i32
  }
  func.func @transform_2(%arg0: i32, %arg1: memref<1xf32, #tpu.memory_space<smem>>) -> (i32, i32) {
    %c0_i32 = arith.constant 0 : i32
    %c0_i32_0 = arith.constant 0 : i32
    %c0_i32_1 = arith.constant 0 : i32
    return %c0_i32, %c0_i32_0 : i32, i32
  }
  func.func @transform_3(%arg0: i32, %arg1: memref<1xf32, #tpu.memory_space<smem>>) -> (i32, i32) {
    %c0_i32 = arith.constant 0 : i32
    %c0_i32_0 = arith.constant 0 : i32
    %c0_i32_1 = arith.constant 0 : i32
    return %c0_i32, %c0_i32_0 : i32, i32
  }
  func.func @transform_4(%arg0: i32, %arg1: memref<1xf32, #tpu.memory_space<smem>>) -> (i32, i32) {
    %c0_i32 = arith.constant 0 : i32
    %c0_i32_0 = arith.constant 0 : i32
    %c0_i32_1 = arith.constant 0 : i32
    return %c0_i32, %c0_i32_0 : i32, i32
  }
  func.func @transform_5(%arg0: i32, %arg1: memref<1xf32, #tpu.memory_space<smem>>) -> (i32, i32) {
    %c0_i32 = arith.constant 0 : i32
    %c0_i32_0 = arith.constant 0 : i32
    %c0_i32_1 = arith.constant 0 : i32
    return %c0_i32, %c0_i32_0 : i32, i32
  }
  func.func @transform_6(%arg0: i32, %arg1: memref<1xf32, #tpu.memory_space<smem>>) -> (i32, i32, i32) {
    %c0_i32 = arith.constant 0 : i32
    %c0_i32_0 = arith.constant 0 : i32
    %c0_i32_1 = arith.constant 0 : i32
    return %arg0, %c0_i32, %c0_i32_0 : i32, i32, i32
  }
  func.func @transform_7(%arg0: i32, %arg1: memref<1xf32, #tpu.memory_space<smem>>) -> (i32, i32, i32) {
    %c0_i32 = arith.constant 0 : i32
    %c0_i32_0 = arith.constant 0 : i32
    %c0_i32_1 = arith.constant 0 : i32
    return %arg0, %c0_i32, %c0_i32_0 : i32, i32, i32
  }
  func.func @transform_8(%arg0: i32, %arg1: memref<1xf32, #tpu.memory_space<smem>>) -> (i32, i32, i32) {
    %c0_i32 = arith.constant 0 : i32
    %c0_i32_0 = arith.constant 0 : i32
    %c0_i32_1 = arith.constant 0 : i32
    return %arg0, %c0_i32, %c0_i32_0 : i32, i32, i32
  }
}

</mosaic_0001>

<bundles_post_ra>
// kernel: tpu_custom_call.1
= control target key start
LH: loop header
LB: loop body
LE: loop exit
PB: predicated region body
PF: predicated region fallthrough
CT: control target
= control target key end

     0   :  { %s1526_s0 = inlined_call_operand.<no memory space> [shape: f32[1], index: 0, kind: input, shape index: {}]   ;;  %s1527_s1 = inlined_call_operand.hbm [shape: f32[8,4,16], index: 1, kind: input, shape index: {}]   ;;  %s1528_s2 = inlined_call_operand.hbm [shape: f32[4,32], index: 2, kind: input, shape index: {}]   ;;  %s1529_s3 = inlined_call_operand.vmem [shape: f32[4,32], index: 3, kind: input, shape index: {}]   ;;  %s1530_s4 = inlined_call_operand.hbm [shape: f32[16,32], index: 4, kind: input, shape index: {}]   ;;  %s1531_s5 = inlined_call_operand.hbm [shape: f32[32,32], index: 5, kind: input, shape index: {}]   ;;  %s1532_s6 = inlined_call_operand.vmem [shape: f32[1,32], index: 6, kind: input, shape index: {}]   ;;  %s1533_s7 = inlined_call_operand.hbm [shape: f32[8,4,32], index: 7, kind: output, shape index: {0}]   ;;  %s1534_s8 = inlined_call_operand.hbm [shape: f32[8,4,32], index: 8, kind: output, shape index: {1}]   ;;  %s1535_s9 = inlined_call_operand.hbm [shape: f32[8,4,32], index: 9, kind: output, shape index: {2}]  }
   0x1   :  { %1543 = sst [smem:[#allocation23_spill]] %s1527_s1 }
   0x2   :  { %1544 = sst [smem:[#allocation24_spill]] %s1528_s2 }
   0x3   :  { %1545 = sst [smem:[#allocation25_spill]] %s1530_s4 }
   0x4   :  { %1546 = sst [smem:[#allocation26_spill]] %s1531_s5 }
   0x5   :  { %15 = sst [smem:[#allocation5]] %s1526_s0 }
   0x6   :  { %16 = vsyncpa [#allocation7], 0 }
   0x7   :  { %18 = vsyncpa [#allocation7 + $0x1], 0 }
   0x8   :  { %19 = vsyncpa [#allocation10], 0 }
   0x9   :  { %20 = vsyncpa [#allocation13], 0 }
   0xa   :  { %21 = vsyncpa [#allocation8], 0 }
   0xb   :  { %23 = vsyncpa [#allocation8 + $0x1], 0 }
   0xc   :  { %24 = vsyncpa [#allocation16], 0 }
   0xd   :  { %26 = vsyncpa [#allocation16 + $0x1], 0  ;;  %s1224_s11 = smov 0   ;;  %s1226_s12 = smov 0  }
   0xe   :  { %s1228_s13 = smov 0   ;;  %s1230_s14 = smov 0  }
   0xf LB: > { %s1245_s0 = sadd.s32 4294967295, %s1158_s14   ;;  %s1539_s15 = sadd.s32 4294967294, %s1158_s14   ;;  %s1158_s14 = sphi %s1230_s14, %s1574_s14   ;;  %s1154_s13 = sphi %s1228_s13, %s1573_s13   ;;  %s1150_s12 = sphi %s1226_s12, %s1572_s12   ;;  %s1146_s11 = sphi %s1224_s11, %s1571_s11  }
  0x10   : > { %p52_p0 = scmp.ne.s32.totalorder %s1150_s12, %s1146_s11  ;;  %p1536_p1 = scmp.eq.s32.totalorder %s1245_s0, 0 }
  0x11   : > { %p187_p3 = scmp.eq.s32.totalorder %s1539_s15, 7  ;;  %p780_p5 = scmp.ge.s32.totalorder %s1158_s14, 1 }
  0x12   : > { %p1256_p4 = por %p1536_p1, %p52_p0  ;;  %p246_p7 = scmp.lt.s32.totalorder %s1158_s14, 9 }
  0x13   : > { %p1261_p6 = por %p187_p3, %p52_p0  ;;  %s1160_s19 = smov [#allocation9]  }
  0x14   : > { %s1547_s16 = scalar_select %p1256_p4, 1, 0 }
  0x15   : > { %s1548_s17 = scalar_select %p1261_p6, 1, 0 }
  0x16   : > { %p1267_p9 = pnand %p780_p5, %p246_p7  ;;  %s259_s20 = sshll.u32 %s1160_s19, 4  ;;  %s260_s20 = int_to_ptr.vmem [resolvable:$true] %s259_s20 }
  0x17   : > { %s1161_s21 = smov [#allocation11]   ;;  %s1162_s24 = smov [#allocation12]  }
  0x18   : > { %s1549_s18 = scalar_select %p1267_p9, 1, 0 }
  0x19   : > { %p853_p10 = pneg %p1267_p9  ;;  %s272_s22 = sshll.u32 %s1161_s21, 4  ;;  %s273_s22 = int_to_ptr.vmem [resolvable:$true] %s272_s22 }
  0x1a   : > { %s285_s25 = sshll.u32 %s1162_s24, 4  ;;  %s935_s26 = scalar_lea.vmem %s260_s20, 64  ;;  %s286_s25 = int_to_ptr.vmem [resolvable:$true] %s285_s25 }
  0x1b   : > { %p1275_p11 = pnand %p853_p10, %p1536_p1  ;;  %p936_p13 = scmp.ne.s32.totalorder %s260_s20, %s935_s26 }
  0x1c   : > { %p943_p5 = scmp.lt.s32.totalorder %s260_s20, %s260_s20  ;;  %p944_p7 = scmp.lt.s32.totalorder %s935_s26, %s935_s26 }
  0x1d   : > { %p926_p12 = pneg %p1275_p11 }
  0x1e   : > { %p945_p8 = por %p944_p7, %p943_p5 }
  0x1f   : > { %p938_p0 = pnand %p936_p13, %p926_p12 }
  0x21   : > { %p939_p3 = pneg %p938_p0 }
  0x23   : > { %p946_p10 = pnand %p945_p8, %p939_p3 }
  0x25   : > { %949 = shalt.err (!%p946_p10)
}
  0x26   : > { %s1551_s2 = sld [smem:[#allocation24_spill]]  ;;  %s961_s29 = scalar_lea.vmem %s273_s22, 256 }
  0x27   : > { %p962_p1 = scmp.ne.s32.totalorder %s273_s22, %s961_s29  ;;  %p969_p13 = scmp.lt.s32.totalorder %s273_s22, %s273_s22 }
  0x28   : > { %p970_p0 = scmp.lt.s32.totalorder %s961_s29, %s961_s29 }
  0x29   : > { %p964_p2 = pnand %p962_p1, %p926_p12 }
  0x2a   : > { %p971_p4 = por %p970_p0, %p969_p13 }
  0x2b   : > { %p965_p6 = pneg %p964_p2 }
  0x2c   : > { %856 = dma.hbm_to_vmem [thread:$0]  (!%p1275_p11), %s1551_s2, 64, %s260_s20, [#allocation10]  }
  0x2d   : > { %p972_p9 = pnand %p971_p4, %p965_p6 }
  0x2f   : > { %975 = shalt.err (!%p972_p9)
}
  0x30   : > { %s1163_s30 = smov 128   ;;  %s1164_s10 = smov 8  }
  0x31   : > { %s1552_s4 = sld [smem:[#allocation25_spill]]  ;;  %s987_s20 = scalar_lea.vmem %s286_s25, 512 }
  0x32   : > { %p988_p8 = scmp.ne.s32.totalorder %s286_s25, %s987_s20  ;;  %p995_p3 = scmp.lt.s32.totalorder %s286_s25, %s286_s25 }
  0x33   : > { %p996_p5 = scmp.lt.s32.totalorder %s987_s20, %s987_s20 }
  0x34   : > { %p990_p1 = pnand %p988_p8, %p926_p12 }
  0x35   : > { %p997_p4 = por %p996_p5, %p995_p3 }
  0x36   : > { %p991_p2 = pneg %p990_p1 }
  0x37   : > { %859 = dma.hbm_to_vmem [thread:$0]  (!%p1275_p11), %s1552_s4, 256, %s273_s22, [#allocation10], %s1163_s30, %s1163_s30, %s1164_s10  }
  0x38   : > { %p998_p6 = pnand %p997_p4, %p991_p2 }
  0x3a   : > { %1001 = shalt.err (!%p998_p6)
}
  0x3b   : > { %s1553_s5 = sld [smem:[#allocation26_spill]]  ;;  %s1306_s22 = sadd.s32 1, %s1158_s14  }
  0x3c   : > { %s36_s27 = ssub.s32 %s1158_s14, %s1306_s22  ;;  %s39_s23 = sadd.s32 1, %s1154_s13 }
  0x3d   : > { %p37_p9 = scmp.eq.s32.totalorder %s36_s27, 0  ;;  %p46_p12 = scmp.ne.s32.totalorder %s1154_s13, %s1150_s12 }
  0x3e   : > { %p47_p7 = scmp.eq.s32.totalorder %s1158_s14, 0  ;;  %p880_p10 = scmp.lt.s32.totalorder %s1158_s14, 8 }
  0x3f   : > { %s1316_s28 = scalar_select %p37_p9, %s1154_s13, %s39_s23  }
  0x40   : > { %p48_p13 = por %p47_p7, %p46_p12  ;;  %p1554_p0 = scmp.eq.s32.totalorder %s1245_s0, 7 }
  0x41   : > { %862 = dma.hbm_to_vmem [thread:$0]  (!%p1275_p11), %s1553_s5, 512, %s286_s25, [#allocation13], %s1163_s30, %s1163_s30, %s1164_s10  }
  0x42   : > { %p1320_p8 = por %p1554_p0, %p46_p12  ;;  %s302_s19 = sand.u32 1, %s1154_s13  }
  0x43   : > { %s786_s21 = sshll.u32 %s1158_s14, 6  ;;  %s785_s25 = sshll.u32 %s302_s19, 2 }
  0x44   : > { %s1555_s29 = scalar_select %p1320_p8, 1, 0 }
  0x45   : > { %s1556_s1 = sld [smem:[#allocation23_spill]]  ;;  %s306_s24 = scalar_lea.vmem [#allocation6], %s785_s25 }
  0x46   : > { %s313_s26 = sshll.u32 %s306_s24, 4  ;;  %p1331_p11 = pnand %p880_p10, %p48_p13  ;;  %s314_s26 = int_to_ptr.vmem [resolvable:$true] %s313_s26 }
  0x47   : > { %s303_s23 = scalar_lea.sflag [#allocation7], %s302_s19 }
  0x48   : > { %p1004_p2 = pneg %p1331_p11 }
  0x4b   : > { %s1329_s20 = scalar_lea.hbm %s1556_s1, %s786_s21  ;;  %s1007_s10 = scalar_lea.hbm %s1556_s1, 512 }
  0x4c   : > { %s1002_s15 = scalar_lea.hbm %s1329_s20, 64  ;;  %p1008_p4 = scmp.lt.s32.totalorder %s1329_s20, %s1556_s1 }
  0x4d   : > { %p1003_p1 = scmp.ne.s32.totalorder %s1329_s20, %s1002_s15  ;;  %p1009_p6 = scmp.lt.s32.totalorder %s1007_s10, %s1002_s15 }
  0x4f   : > { %p1005_p3 = pnand %p1004_p2, %p1003_p1  ;;  %p1010_p9 = por %p1009_p6, %p1008_p4 }
  0x51   : > { %p1006_p5 = pneg %p1005_p3 }
  0x53   : > { %p1011_p12 = pnand %p1010_p9, %p1006_p5 }
  0x55   : > { %1014 = shalt.err (!%p1011_p12)
}
  0x56   : > { %s1015_s24 = scalar_lea.vmem %s314_s26, 64  ;;  %s1165_s19 = smov [#allocation6]  }
  0x57   : > { %p1016_p7 = scmp.ne.s32.totalorder %s314_s26, %s1015_s24  ;;  %s1020_s4 = sshll.u32 %s1165_s19, 4  ;;  %s1021_s4 = int_to_ptr.vmem [resolvable:$false] %s1020_s4 }
  0x58   : > { %s1022_s5 = scalar_lea.vmem %s1021_s4, 128  ;;  %p1023_p0 = scmp.lt.s32.totalorder %s314_s26, %s1021_s4 }
  0x59   : > { %p1018_p10 = pnand %p1016_p7, %p1004_p2  ;;  %p1024_p1 = scmp.lt.s32.totalorder %s1022_s5, %s1015_s24 }
  0x5b   : > { %p1019_p13 = pneg %p1018_p10  ;;  %p1025_p3 = por %p1024_p1, %p1023_p0 }
  0x5d   : > { %p1026_p8 = pnand %p1025_p3, %p1019_p13 }
  0x5f   : > { %1029 = shalt.err (!%p1026_p8)
}
  0x60   : > { %866 = dma.hbm_to_vmem [thread:$0]  (!%p1331_p11), %s1329_s20, 64, %s314_s26, %s303_s23  }
  0x61   : > { %p1558_p5 = scmp.ne.s32.totalorder %s1549_s18, 0 }
  0x62   : > { %s1352_s2 = sand.u32 (!%p1558_p5), 1, %s1150_s12   ;;  %p1559_p2 = scmp.ne.s32.totalorder (!%p1558_p5), %s1547_s16, 0 }
  0x63   : > { %322 = sbr.rel (%p1558_p5) target bundleno = 386 (0x182), region = 44  ;;  %s1355_s15 = sshll.u32 (!%p1558_p5), %s1352_s2, 2 }
  0x64   : > { %s325_s4 = scalar_lea.sflag (!%p1558_p5), [#allocation7], %s1352_s2  ;;  %s328_s5 = scalar_lea.vmem (!%p1558_p5), [#allocation6], %s1355_s15 }
  0x68   : > { %1125 = dma.done.wait (%p1559_p2), %s325_s4, 64  }
  0x69   : > { %1127 = vsyncadd (%p1559_p2), %s325_s4, 4294967232  ;;  %p1560_p8 = scmp.eq.s32.totalorder %s1245_s0, 0 }
  0x6b   : > { %1129 = dma.done.wait (%p1560_p8), [#allocation10], 320   ;;  %p1561_p11 = pmov %p1560_p8 }
  0x6c   : > { %p1562_p4 = pmov %p1560_p8 }
  0x6d   : > { %1131 = vsyncadd (%p1561_p11), [#allocation10], 4294966976 }
  0x6e   : > { %1133 = dma.done.wait (%p1562_p4), [#allocation13], 512   ;;  %p1563_p6 = pmov %p1562_p4 }
  0x6f   : > { %s368_s18 = scalar_lea.vmem [#allocation14], %s1355_s15  ;;  %s1542_s20 = scalar_lea.vmem [#allocation15], %s1355_s15 }
  0x70   : > { %1135 = vsyncadd (%p1563_p6), [#allocation13], 4294966784  ;;  %s1541_s26 = scalar_lea.vmem [#allocation17], %s1355_s15  ;;  %p1564_p9 = scmp.ne.s32.totalorder %s1245_s0, 0 }
  0x72   : > { %386 = sbr.rel (%p1564_p9) target bundleno = 121 (0x79), region = 64 }
  0x77   : > { %v387_v0 = vld [vmem:[#allocation9] sm:$0xf]  ;;  %vm388_vm0 = vcmask 257024   ;;  %v390_v1 = vld [vmem:[%s1529_s3] sm:$0xf] }
  0x78   : > { %389 = vst.msk [vmem:[#allocation2] sm:$0xf] %vm388_vm0, %v387_v0  ;;  %391 = vst.msk [vmem:[#allocation3] sm:$0xf] %vm388_vm0, %v390_v1 }
  0x79 PF: > { %v397_v2 = vld [vmem:[#allocation12 + $0x18] sm:$0xff]  ;;  %v1166_v4 = vmov 0.0   ;;  %v396_v5 = vld [vmem:[#allocation12 + $0x10] sm:$0xff]  ;;  %v395_v7 = vld [vmem:[#allocation12 + $0x8] sm:$0xff]  ;;  %vm401_vm1 = vcmask 130048   ;;  %vm1167_vm2 = vmmov 0  }
  0x7a   : > { %v400_v3 = vld [vmem:[#allocation11 + $0x8] sm:$0xff]  ;;  %822 = vmatprep.subr.mxu1 %v1166_v4  ;;  %815 = vmatprep.subr.mxu0 %v1166_v4  ;;  %v399_v6 = vld [vmem:[#allocation11] sm:$0xff]  ;;  %v398_v8 = vld [vmem:[%s328_s5] sm:$0xf]  ;;  %vm475_vm3 = vcmask 261120   ;;  %s392_s23 = sld [smem:[#allocation5]] }
  0x7b   : > { %823 = vmatpush3.msra.mxu1 %v397_v2  ;;  %816 = vmatpush3.msra.mxu0 %v400_v3  ;;  %v394_v9 = vld [vmem:[#allocation12] sm:$0xff]  ;;  %v798_v16 = vld [vmem:[%s1532_s6] ss:$0 sm:$0xff]  ;;  %s1391_s10 = sshll.u32 %s1245_s0, 6  ;;  %s593_s25 = sshll.u32 %s368_s18, 4  ;;  %vm563_vm4 = vcmask 257024   ;;  %s1404_s25 = int_to_ptr.vmem [resolvable:$true] %s593_s25 }
  0x7c   : > { %824 = vmatprep.subr.mxu1 %v1166_v4  ;;  %817 = vmatprep.subr.mxu0 %v1166_v4  ;;  %s606_s19 = sshll.u32 %s1542_s20, 4  ;;  %s1402_s16 = scalar_lea.hbm %s1533_s7, %s1391_s10  ;;  %s1420_s19 = int_to_ptr.vmem [resolvable:$true] %s606_s19 }
  0x7d   : > { %825 = vmatpush3.msra.mxu1 %v396_v5  ;;  %818 = vmatpush3.msra.mxu0 %v399_v6  ;;  %s1408_s27 = sshll.u32 %s1541_s26, 4  ;;  %s1418_s30 = scalar_lea.hbm %s1534_s8, %s1391_s10  ;;  %s1453_s27 = int_to_ptr.vmem [resolvable:$true] %s1408_s27 }
  0x7e   : > { %826 = vmatprep.subr.mxu1 %v1166_v4  ;;  %819 = vmatprep.mubr.msk.f32.mxu0 %vm1167_vm2, %v1166_v4  ;;  %s570_s4 = scalar_lea.sflag [#allocation8], %s1352_s2  ;;  %s1030_s5 = scalar_lea.vmem %s1404_s25, 64 }
  0x7f   : > { %827 = vmatpush3.msra.mxu1 %v395_v7  ;;  %820 = vmatmul.mubr.msk.f32.vlgmr.msra.gmra.mxu0 %vm401_vm1, %v398_v8  ;;  %v393_v10 = vld [vmem:[#allocation2] sm:$0xf]  ;;  %v557_v12 = vld [vmem:[#allocation3] sm:$0xf]  ;;  %p1031_p12 = scmp.ne.s32.totalorder %s1404_s25, %s1030_s5  ;;  %p1565_p7 = scmp.ne.s32.totalorder %s1555_s29, 0 }
  0x80   : > { %828 = vmatprep.subr.mxu1 %v1166_v4  ;;  %830 = vmatprep.mubr.msk.f32.mxu1 %vm1167_vm2, %v1166_v4  ;;  %v558_v13 = vstv %s392_s23  ;;  %s1168_s26 = smov [#allocation14]  }
  0x81   : > { %829 = vmatpush3.msra.mxu1 %v394_v9  ;;  %v559_v18 = vmul.f32 %v558_v13, %v557_v12  ;;  %p1032_p10 = pnand %p1031_p12, %p1565_p7  ;;  %s1034_s24 = sshll.u32 %s1168_s26, 4  ;;  %s1035_s24 = int_to_ptr.vmem [resolvable:$false] %s1034_s24 }
  0x82   : > { %831 = vmatmul.mubr.msk.f32.vlgmr.msra.gmra.mxu1 %vm475_vm3, %v393_v10  ;;  %s1036_s20 = scalar_lea.vmem %s1035_s24, 128  ;;  %p1037_p0 = scmp.lt.s32.totalorder %s1404_s25, %s1035_s24 }
  0x83   : > { %p1033_p13 = pneg %p1032_p10  ;;  %p1038_p1 = scmp.lt.s32.totalorder %s1036_s20, %s1030_s5 }
  0x85   : > { %p1039_p3 = por %p1038_p1, %p1037_p0 }
  0x87   : > { %p1040_p5 = pnand %p1039_p3, %p1033_p13 }
 0x13f   : > { %v471_v11 = vpop.f32.mrf.mxu0 }
 0x141   : > { %v821_v14 = vpop.f32.mrf.mxu0 }
 0x142   : > { %v545_v15 = vpop.f32.mrf.mxu1 }
 0x143   : > { %v546_v17 = vadd.f32 %v545_v15, %v471_v11 }
 0x144   : > { %v832_v19 = vpop.f32.mrf.mxu1 }
 0x145   : > { %v556_v20 = vadd.f32 %v798_v16, %v546_v17 }
 0x147   : > { %567 = vst.msk [vmem:[#allocation2] sm:$0xf] %vm563_vm4, %v556_v20  ;;  %564 = vst.msk [vmem:[%s368_s18] sm:$0xf] %vm563_vm4, %v556_v20  ;;  %v560_v21 = vsub.f32 %v556_v20, %v559_v18 }
 0x148   : > { %1043 = shalt.err (!%p1040_p5)
}
 0x149   : > { %s1044_s18 = scalar_lea.hbm %s1402_s16, 64  ;;  %s1048_s26 = scalar_lea.hbm %s1533_s7, 512 }
 0x14a   : > { %p1045_p2 = scmp.ne.s32.totalorder %s1402_s16, %s1044_s18  ;;  %p1049_p4 = scmp.lt.s32.totalorder %s1402_s16, %s1533_s7 }
 0x14b   : > { %p1050_p6 = scmp.lt.s32.totalorder %s1048_s26, %s1044_s18 }
 0x14c   : > { %p1046_p8 = pnand %p1045_p2, %p1565_p7 }
 0x14d   : > { %p1051_p9 = por %p1050_p6, %p1049_p4 }
 0x14e   : > { %p1047_p11 = pneg %p1046_p8 }
 0x150   : > { %p1052_p12 = pnand %p1051_p9, %p1047_p11 }
 0x152   : > { %1055 = shalt.err (!%p1052_p12)
}
 0x153   : > { %847 = dma.vmem_to_hbm [thread:$0]  (%p1565_p7), %s1404_s25, 64, %s1402_s16, %s570_s4   ;;  %vm561_vm5 = vcmp.gt.f32.partialorder %v560_v21, 1.0 }
 0x154   : > { %s1566_s1 = scalar_lea.vmem [#allocation15], %s1355_s15  ;;  %s1450_s5 = scalar_lea.hbm %s1535_s9, %s1391_s10 }
 0x155   : > { %565 = vst.msk [vmem:[%s1566_s1] sm:$0xf] %vm563_vm4, %v560_v21  ;;  %s1567_s18 = sand.u32 1, %s1245_s0   ;;  %s1056_s23 = scalar_lea.vmem %s1420_s19, 64 }
 0x156   : > { %s1457_s2 = scalar_lea.sflag [#allocation16], %s1567_s18  ;;  %p1057_p10 = scmp.ne.s32.totalorder %s1420_s19, %s1056_s23 }
 0x157   : > { %s1169_s25 = smov [#allocation15]  }
 0x158   : > { %p1058_p13 = pnand %p1057_p10, %p1565_p7  ;;  %s1060_s16 = sshll.u32 %s1169_s25, 4  ;;  %s1061_s16 = int_to_ptr.vmem [resolvable:$false] %s1060_s16 }
 0x159   : > { %s1062_s4 = scalar_lea.vmem %s1061_s16, 128  ;;  %p1063_p1 = scmp.lt.s32.totalorder %s1420_s19, %s1061_s16 }
 0x15a   : > { %p1059_p0 = pneg %p1058_p13  ;;  %p1064_p3 = scmp.lt.s32.totalorder %s1062_s4, %s1056_s23 }
 0x15c   : > { %p1065_p5 = por %p1064_p3, %p1063_p1 }
 0x15e   : > { %p1066_p2 = pnand %p1065_p5, %p1059_p0 }
 0x160   : > { %1069 = shalt.err (!%p1066_p2)
}
 0x161   : > { %s1070_s0 = scalar_lea.hbm %s1418_s30, 64  ;;  %s1074_s21 = scalar_lea.hbm %s1534_s8, 512 }
 0x162   : > { %p1071_p8 = scmp.ne.s32.totalorder %s1418_s30, %s1070_s0  ;;  %p1075_p6 = scmp.lt.s32.totalorder %s1418_s30, %s1534_s8 }
 0x163   : > { %p1076_p9 = scmp.lt.s32.totalorder %s1074_s21, %s1070_s0 }
 0x164   : > { %p1072_p11 = pnand %p1071_p8, %p1565_p7 }
 0x165   : > { %p1077_p12 = por %p1076_p9, %p1075_p6 }
 0x166   : > { %p1073_p4 = pneg %p1072_p11 }
 0x168   : > { %p1078_p10 = pnand %p1077_p12, %p1073_p4 }
 0x16a   : > { %1081 = shalt.err (!%p1078_p10)
}
 0x16b   : > { %848 = dma.vmem_to_hbm [thread:$0]  (%p1565_p7), %s1420_s19, 64, %s1418_s30, %s1457_s2   ;;  %v562_v22 = vsel %vm561_vm5, 1.0, %v1166_v4 }
 0x16c   : > { %s1568_s24 = scalar_lea.vmem [#allocation17], %s1355_s15  ;;  %568 = vst.msk [vmem:[#allocation3] sm:$0xf] %vm563_vm4, %v562_v22  ;;  %s1082_s18 = scalar_lea.vmem %s1453_s27, 64 }
 0x16d   : > { %566 = vst.msk [vmem:[%s1568_s24] sm:$0xf] %vm563_vm4, %v562_v22  ;;  %p1083_p13 = scmp.ne.s32.totalorder %s1453_s27, %s1082_s18  ;;  %s1170_s23 = smov [#allocation17]  }
 0x16e   : > { %s1086_s25 = sshll.u32 %s1170_s23, 4  ;;  %s1087_s25 = int_to_ptr.vmem [resolvable:$false] %s1086_s25 }
 0x16f   : > { %p1084_p0 = pnand %p1083_p13, %p1565_p7  ;;  %s1088_s16 = scalar_lea.vmem %s1087_s25, 128 }
 0x170   : > { %p1089_p3 = scmp.lt.s32.totalorder %s1453_s27, %s1087_s25  ;;  %p1090_p5 = scmp.lt.s32.totalorder %s1088_s16, %s1082_s18 }
 0x171   : > { %p1085_p1 = pneg %p1084_p0 }
 0x172   : > { %p1091_p2 = por %p1090_p5, %p1089_p3 }
 0x174   : > { %p1092_p8 = pnand %p1091_p2, %p1085_p1 }
 0x176   : > { %1095 = shalt.err (!%p1092_p8)
}
 0x177   : > { %s1096_s15 = scalar_lea.hbm %s1450_s5, 64  ;;  %s1100_s4 = scalar_lea.hbm %s1535_s9, 512 }
 0x178   : > { %p1097_p11 = scmp.ne.s32.totalorder %s1450_s5, %s1096_s15  ;;  %p1101_p9 = scmp.lt.s32.totalorder %s1450_s5, %s1535_s9 }
 0x179   : > { %p1102_p12 = scmp.lt.s32.totalorder %s1100_s4, %s1096_s15 }
 0x17a   : > { %p1098_p4 = pnand %p1097_p11, %p1565_p7 }
 0x17b   : > { %p1103_p10 = por %p1102_p12, %p1101_p9 }
 0x17c   : > { %p1099_p6 = pneg %p1098_p4 }
 0x17e   : > { %p1104_p13 = pnand %p1103_p10, %p1099_p6 }
 0x180   : > { %1107 = shalt.err (!%p1104_p13)
}
 0x181   : > { %849 = dma.vmem_to_hbm [thread:$0]  (%p1565_p7), %s1453_s27, 64, %s1450_s5, %s1457_s2  }
 0x182 PF: > { %p884_p0 = scmp.ge.s32.totalorder %s1158_s14, 2  ;;  %s631_s26 = sand.u32 1, %s1146_s11  }
 0x183   : > { %p1569_p1 = scmp.ne.s32.totalorder %s1548_s17, 0  ;;  %s632_s21 = scalar_lea.sflag [#allocation8], %s631_s26 }
 0x185   : > { %p868_p3 = pnand %p884_p0, %p1569_p1 }
 0x187   : > { %p869_p5 = pneg %p868_p3 }
 0x189   : > { %1137 = dma.done.wait (%p869_p5), %s632_s21, 64  }
 0x18a   : > { %1139 = vsyncadd (%p869_p5), %s632_s21, 4294967232  ;;  %s1570_s1 = sadd.s32 4294967294, %s1158_s14  }
 0x18b   : > { %s640_s20 = sand.u32 1, %s1570_s1  }
 0x18c   : > { %s641_s29 = scalar_lea.sflag [#allocation16], %s640_s20 }
 0x18d   : > { %1141 = dma.done.wait (%p869_p5), %s641_s29, 128  }
 0x18e   : > { %1143 = vsyncadd (%p869_p5), %s641_s29, 4294967168  ;;  %p29_p7 = scmp.ge.s32.totalorder %s1306_s22, 10   ;;  %s1571_s11 = smov %s1150_s12 }
 0x18f   : > { %s1572_s12 = smov %s1154_s13  ;;  %s1573_s13 = smov %s1316_s28 }
 0x190   : > { %s1574_s14 = smov %s1306_s22  ;;  %31 = sbr.rel (!%p29_p7) target bundleno = 15 (0xf), region = 137 }
 0x195   :  { %655 = vsyncpa [#allocation7], 1 }
 0x196   :  { %657 = vsyncpa [#allocation7 + $0x1], 1 }
 0x197   :  { %658 = vsyncpa [#allocation10], 1 }
 0x198   :  { %659 = vsyncpa [#allocation13], 1 }
 0x199   :  { %660 = vsyncpa [#allocation8], 1 }
 0x19a   :  { %662 = vsyncpa [#allocation8 + $0x1], 1 }
 0x19b   :  { %663 = vsyncpa [#allocation16], 1 }
 0x19c   :  { %665 = vsyncpa [#allocation16 + $0x1], 1 }

</bundles_post_ra>
